<compile_context>
chip_gen: v5e
topology: v5e:2x2
jax: 0.10.0
libtpu: 0.0.40
codegen_flags: <defaults>
</compile_context>

<pallas_src>
import jax
import jax.numpy as jnp
from jax.experimental import pallas as pl
from jax.experimental.pallas import tpu as pltpu

LANES = 128  # lane width: batch tiles are multiples of 128


def policy_kernel(xt_ref, w1_ref, b1_ref, w2_ref, b2_ref, ot_ref):
    # Feature-major (batch-on-lanes) formulation:
    #   xt: (in, tb)    w1: (hid, in)   b1: (hid, 1)
    #   w2: (out, hid)  b2: (out, 1)    ot: (out, tb)
    h = jnp.dot(w1_ref[...], xt_ref[...], preferred_element_type=jnp.float32)
    h = jnp.maximum(h + b1_ref[...], 0.0)               # Linear1 + ReLU
    y = jnp.dot(w2_ref[...], h, preferred_element_type=jnp.float32)
    ot_ref[...] = jax.nn.sigmoid(y + b2_ref[...]).astype(ot_ref.dtype)


def _round_up(n, m):
    return ((n + m - 1) // m) * m


def policy_forward_t(xt, w1, b1, w2, b2, block_b=2048):
    """Feature-major forward pass.

    xt: (in, B)  w1: (hidden, in)  b1: (hidden, 1)  w2: (out, hidden)  b2: (out, 1)
    Returns yT of shape (out, padded_B) with padded_B >= B (extra columns are
    sigmoid(b2) junk; trim in the caller if needed).
    """
    in_size, B = xt.shape
    out_size = w2.shape[0]

    # Batch tile: multiple of 128 lanes, no larger than needed.
    tb = min(_round_up(block_b, LANES), _round_up(B, LANES))
    # Keep >= 2 grid steps for larger batches so the "parallel" batch axis can
    # shard across both TensorCores on v7x (no-op on single-TC v5e/v6e).
    half = _round_up(-(-B // 2), LANES)
    if LANES <= half < tb:
        tb = half

    padded_B = _round_up(B, tb)
    if padded_B != B:
        xt = jnp.pad(xt, ((0, 0), (0, padded_B - B)))

    grid = (padded_B // tb,)

    return pl.pallas_call(
        policy_kernel,
        out_shape=jax.ShapeDtypeStruct((out_size, padded_B), jnp.float32),
        grid=grid,
        in_specs=[
            # x streams one lane-dense (in, tb) tile per grid step.
            pl.BlockSpec((in_size, tb), lambda i: (0, i)),
            # Weights / biases: constant block index -> stay VMEM-resident.
            pl.BlockSpec(w1.shape, lambda i: (0, 0)),
            pl.BlockSpec(b1.shape, lambda i: (0, 0)),
            pl.BlockSpec(w2.shape, lambda i: (0, 0)),
            pl.BlockSpec(b2.shape, lambda i: (0, 0)),
        ],
        out_specs=pl.BlockSpec((out_size, tb), lambda i: (0, i)),
        compiler_params=pltpu.CompilerParams(
            dimension_semantics=("parallel",),
            vmem_limit_bytes=32 * 1024 * 1024,
        ),
    )(xt, w1, b1, w2, b2)


def policy_forward(x, w1, b1, w2, b2, block_b=2048):
    """PyTorch-layout convenience wrapper: x (B, in) -> (B, out).

    The transposes here are tiny ((B, 4) and (2, B)); callers chasing peak
    throughput should keep activations feature-major and call policy_forward_t.
    """
    B = x.shape[0]
    yt = policy_forward_t(x.T, w1, b1, w2, b2, block_b=block_b)
    return yt[:, :B].T  # trim padding + transpose back (fused, tiny)


def init_policy_params(key, input_size, hidden_size, output_size):
    """Matches the PyTorch module: weights ~ Normal(0, 0.1), biases = 0.
    Weights kept in native PyTorch (out, in) layout; biases as (out, 1)."""
    k1, k2 = jax.random.split(key)
    w1 = 0.1 * jax.random.normal(k1, (hidden_size, input_size), dtype=jnp.float32)
    b1 = jnp.zeros((hidden_size, 1), dtype=jnp.float32)
    w2 = 0.1 * jax.random.normal(k2, (output_size, hidden_size), dtype=jnp.float32)
    b2 = jnp.zeros((output_size, 1), dtype=jnp.float32)
    return w1, b1, w2, b2


def _reference(x, w1, b1, w2, b2):
    h = jnp.maximum(
        jnp.dot(x, w1.T, precision=jax.lax.Precision.HIGHEST) + b1.T, 0.0)
    return jax.nn.sigmoid(
        jnp.dot(h, w2.T, precision=jax.lax.Precision.HIGHEST) + b2.T)


if __name__ == "__main__":
    # Small shapes consistent with a REINFORCE policy net (e.g. CartPole-ish).
    batch, input_size, hidden_size, output_size = 8, 4, 32, 2

    key = jax.random.PRNGKey(0)
    kx, kp, kx_big = jax.random.split(key, 3)
    w1, b1, w2, b2 = init_policy_params(kp, input_size, hidden_size, output_size)

    # Tolerances are loosened vs. the HIGHEST-precision reference because the
    # kernel now uses DEFAULT MXU precision (expected, not a bug).
    tol = dict(atol=2e-2, rtol=2e-2)

    # 1) Small-batch case (single 128-lane tile, padded path).
    x = jax.random.normal(kx, (batch, input_size), dtype=jnp.float32)
    out = jax.block_until_ready(policy_forward(x, w1, b1, w2, b2))
    assert out.shape == (batch, output_size)
    assert jnp.allclose(out, _reference(x, w1, b1, w2, b2), **tol)

    # 2) Amortized case: many environments / rollout steps in one call.
    #    B=1024 -> tb=512, grid of 2 "parallel" steps (both TCs on v7x).
    big_batch = 1024
    x_big = jax.random.normal(kx_big, (big_batch, input_size), dtype=jnp.float32)
    out_big = jax.block_until_ready(policy_forward(x_big, w1, b1, w2, b2))
    assert out_big.shape == (big_batch, output_size)
    assert jnp.allclose(out_big, _reference(x_big, w1, b1, w2, b2), **tol)

    print("KERNEL_OK")
</pallas_src>

<mosaic_0001>
module attributes {stable_mosaic.version = 11 : i64} {
  func.func @policy_kernel(%arg0: i32, %arg1: memref<4x128xf32, #tpu.memory_space<vmem>>, %arg2: memref<32x4xf32, #tpu.memory_space<vmem>>, %arg3: memref<32x1xf32, #tpu.memory_space<vmem>>, %arg4: memref<2x32xf32, #tpu.memory_space<vmem>>, %arg5: memref<2x1xf32, #tpu.memory_space<vmem>>, %arg6: memref<2x128xf32, #tpu.memory_space<vmem>>) attributes {dimension_semantics = [#tpu.dimension_semantics<parallel>], iteration_bounds = array<i64: 1>, scalar_prefetch = 0 : i64, scratch_operands = 0 : i64, tpu.core_type = #tpu.core_type<tc>, window_params = [{transform_indices = @transform_0, window_bounds = array<i64: 4, 128>}, {pipeline_mode = #tpu.pipeline_mode<synchronous>, transform_indices = @transform_1, window_bounds = array<i64: 32, 4>}, {pipeline_mode = #tpu.pipeline_mode<synchronous>, transform_indices = @transform_2, window_bounds = array<i64: 32, 1>}, {pipeline_mode = #tpu.pipeline_mode<synchronous>, transform_indices = @transform_3, window_bounds = array<i64: 2, 32>}, {pipeline_mode = #tpu.pipeline_mode<synchronous>, transform_indices = @transform_4, window_bounds = array<i64: 2, 1>}, {transform_indices = @transform_5, window_bounds = array<i64: 2, 128>}]} {
    %c0 = arith.constant 0 : index
    %c0_0 = arith.constant 0 : index
    %0 = vector.load %arg2[%c0, %c0_0] : memref<32x4xf32, #tpu.memory_space<vmem>>, vector<32x4xf32>
    %c0_1 = arith.constant 0 : index
    %c0_2 = arith.constant 0 : index
    %1 = vector.load %arg1[%c0_1, %c0_2] : memref<4x128xf32, #tpu.memory_space<vmem>>, vector<4x128xf32>
    %cst = arith.constant dense<0.000000e+00> : vector<32x128xf32>
    %2 = tpu.matmul %0, %1, %cst {dimension_numbers = #tpu.dot_dimension_numbers<[1], [0], [0], [1], [0, 0, 1, 1], [], []>} : vector<32x4xf32>, vector<4x128xf32>, vector<32x128xf32> -> vector<32x128xf32>
    %c0_3 = arith.constant 0 : index
    %c0_4 = arith.constant 0 : index
    %3 = vector.load %arg3[%c0_3, %c0_4] : memref<32x1xf32, #tpu.memory_space<vmem>>, vector<32x1xf32>
    %4 = vector.broadcast %3 : vector<32x1xf32> to vector<32x128xf32>
    %5 = arith.addf %2, %4 : vector<32x128xf32>
    %cst_5 = arith.constant 0.000000e+00 : f32
    %6 = vector.broadcast %cst_5 : f32 to vector<32x128xf32>
    %7 = arith.maximumf %5, %6 : vector<32x128xf32>
    %c0_6 = arith.constant 0 : index
    %c0_7 = arith.constant 0 : index
    %8 = vector.load %arg4[%c0_6, %c0_7] : memref<2x32xf32, #tpu.memory_space<vmem>>, vector<2x32xf32>
    %cst_8 = arith.constant dense<0.000000e+00> : vector<2x128xf32>
    %9 = tpu.matmul %8, %7, %cst_8 {dimension_numbers = #tpu.dot_dimension_numbers<[1], [0], [0], [1], [0, 0, 1, 1], [], []>} : vector<2x32xf32>, vector<32x128xf32>, vector<2x128xf32> -> vector<2x128xf32>
    %c0_9 = arith.constant 0 : index
    %c0_10 = arith.constant 0 : index
    %10 = vector.load %arg5[%c0_9, %c0_10] : memref<2x1xf32, #tpu.memory_space<vmem>>, vector<2x1xf32>
    %11 = vector.broadcast %10 : vector<2x1xf32> to vector<2x128xf32>
    %12 = arith.addf %9, %11 : vector<2x128xf32>
    %13 = arith.negf %12 : vector<2x128xf32>
    %14 = math.exp %13 : vector<2x128xf32>
    %cst_11 = arith.constant 1.000000e+00 : f32
    %15 = vector.broadcast %cst_11 : f32 to vector<2x128xf32>
    %16 = arith.addf %15, %14 : vector<2x128xf32>
    %17 = arith.divf %15, %16 : vector<2x128xf32>
    %c0_12 = arith.constant 0 : index
    %c0_13 = arith.constant 0 : index
    %18 = vector.load %arg6[%c0_12, %c0_13] : memref<2x128xf32, #tpu.memory_space<vmem>>, vector<2x128xf32>
    tpu.vector_store %arg6[%c0_12, %c0_13], %17 {strides = array<i32>} : memref<2x128xf32, #tpu.memory_space<vmem>>, vector<2x128xf32>,
    return
  }
  func.func @transform_0(%arg0: i32) -> (i32, i32) {
    %c0_i32 = arith.constant 0 : i32
    %c0_i32_0 = arith.constant 0 : i32
    return %c0_i32, %arg0 : i32, i32
  }
  func.func @transform_1(%arg0: i32) -> (i32, i32) {
    %c0_i32 = arith.constant 0 : i32
    %c0_i32_0 = arith.constant 0 : i32
    %c0_i32_1 = arith.constant 0 : i32
    return %c0_i32, %c0_i32_0 : i32, i32
  }
  func.func @transform_2(%arg0: i32) -> (i32, i32) {
    %c0_i32 = arith.constant 0 : i32
    %c0_i32_0 = arith.constant 0 : i32
    %c0_i32_1 = arith.constant 0 : i32
    return %c0_i32, %c0_i32_0 : i32, i32
  }
  func.func @transform_3(%arg0: i32) -> (i32, i32) {
    %c0_i32 = arith.constant 0 : i32
    %c0_i32_0 = arith.constant 0 : i32
    %c0_i32_1 = arith.constant 0 : i32
    return %c0_i32, %c0_i32_0 : i32, i32
  }
  func.func @transform_4(%arg0: i32) -> (i32, i32) {
    %c0_i32 = arith.constant 0 : i32
    %c0_i32_0 = arith.constant 0 : i32
    %c0_i32_1 = arith.constant 0 : i32
    return %c0_i32, %c0_i32_0 : i32, i32
  }
  func.func @transform_5(%arg0: i32) -> (i32, i32) {
    %c0_i32 = arith.constant 0 : i32
    %c0_i32_0 = arith.constant 0 : i32
    return %c0_i32, %arg0 : i32, i32
  }
}

</mosaic_0001>

<bundles_post_ra>
// kernel: tpu_custom_call.1
= control target key start
LH: loop header
LB: loop body
LE: loop exit
PB: predicated region body
PF: predicated region fallthrough
CT: control target
= control target key end

     0   :  { %vm63_vm0 = vcmask 1043456   ;;  %vm50_vm1 = vcmask 31744   ;;  %v211_v5 = vmov 0   ;;  %s283_s0 = inlined_call_operand.vmem [shape: f32[4,128], index: 0, kind: input, shape index: {}]   ;;  %s284_s1 = inlined_call_operand.vmem [shape: f32[32,4], index: 1, kind: input, shape index: {}]   ;;  %s285_s2 = inlined_call_operand.vmem [shape: f32[32,1], index: 2, kind: input, shape index: {}]   ;;  %s286_s3 = inlined_call_operand.vmem [shape: f32[2,32], index: 3, kind: input, shape index: {}]   ;;  %s287_s4 = inlined_call_operand.vmem [shape: f32[2,1], index: 4, kind: input, shape index: {}]   ;;  %s288_s5 = inlined_call_operand.hbm [shape: f32[2,128], index: 5, kind: output, shape index: {}]  }
   0x1   :  { %v25_v0 = vld [vmem:[%s283_s0] sm:$0xf]  ;;  %v22_v1 = vld [vmem:[%s284_s1 + $0x8] sm:$0xff]  ;;  %v24_v2 = vld [vmem:[%s284_s1 + $0x18] sm:$0xff]  ;;  %178 = vset.pattern.permute.xlu0 %v211_v5 }
   0x2   :  { %174 = vmatpush.msk.msra.mxu2 %vm63_vm0, %v25_v0  ;;  %175 = vmatpush.msk.msra.mxu3 %vm63_vm0, %v25_v0  ;;  %v29_v3 = vld [vmem:[%s285_s2 + $0x18] sm:$0xff]  ;;  %v21_v4 = vld [vmem:[%s284_s1] sm:$0xff]  ;;  %v27_v6 = vld [vmem:[%s285_s2 + $0x8] sm:$0xff] }
   0x3   :  { %169 = vmatmul.msk.f32.vlgmr.msra.gmra.mxu2 %vm50_vm1, %v22_v1  ;;  %171 = vmatmul.msk.f32.vlgmr.msra.gmra.mxu3 %vm50_vm1, %v24_v2 }
   0x4   :  { %167 = vmatpush.msk.msra.mxu0 %vm63_vm0, %v25_v0 }
   0x5   :  { %10 = vsyncpa [#allocation3], 0  ;;  %47 = vperm.xlu0 %178, %v29_v3   ;;  %168 = vmatmul.msk.f32.vlgmr.msra.gmra.mxu0 %vm50_vm1, %v21_v4  ;;  %v23_v7 = vld [vmem:[%s284_s1 + $0x10] sm:$0xff]  ;;  %v26_v9 = vld [vmem:[%s285_s2] sm:$0xff]  ;;  %vm107_vm2 = vcmask 261120   ;;  %s158_s14 = sshll.u32 %s288_s5, 4  ;;  %s159_s14 = int_to_ptr.hbm [resolvable:$true] %s158_s14 }
   0x6   :  { %179 = vset.pattern.permute.xlu1 %v211_v5  ;;  %180 = vset.pattern.permute.xlu2 %v211_v5  ;;  %v28_v8 = vld [vmem:[%s285_s2 + $0x10] sm:$0xff]  ;;  %v101_v10 = vld [vmem:[%s287_s4] sm:$0x3]  ;;  %s212_s4 = smov [#allocation2]  }
   0x7   :  { %37 = vperm.xlu1 %179, %v27_v6   ;;  %104 = vperm.xlu2 %180, %v101_v10   ;;  %v100_v27 = vld [vmem:[%s286_s3] sm:$0x3]  ;;  %s156_s3 = sshll.u32 %s212_s4, 4  ;;  %s157_s3 = int_to_ptr.vmem [resolvable:$true] %s156_s3 }
   0xb   :  { %170 = vmatmul.msk.f32.gmra.mxu2 %vm50_vm1, %v23_v7 }
   0xd   :  { %42 = vperm.xlu0 %178, %v28_v8  }
   0xf   :  { %32 = vperm.xlu1 %179, %v26_v9  }
  0x61   :  { %v105_v28 = vpop.permute.xlu2 %104 }
  0x77   :  { %v48_v11 = vpop.permute.xlu0 %47 }
  0x79   :  { %v38_v12 = vpop.permute.xlu1 %37 }
  0x7f   :  { %v43_v17 = vpop.permute.xlu0 %42 }
  0x81   :  { %v33_v18 = vpop.permute.xlu1 %32 }
  0x82   :  { %v84_v19 = vpop.f32.mrf.mxu0 }
  0x83   :  { %v85_v23 = vadd.f32 %v84_v19, %v33_v18 }
  0x85   :  { %v96_v26 = vmax.f32 %v85_v23, 0.0 }
  0x86   :  { %v87_v13 = vpop.f32.mrf.mxu2  ;;  %v93_v14 = vpop.f32.mrf.mxu3 }
  0x87   :  { %v94_v15 = vadd.f32 %v93_v14, %v48_v11  ;;  %v88_v21 = vadd.f32 %v87_v13, %v38_v12 }
  0x89   :  { %v99_v16 = vmax.f32 %v94_v15, 0.0  ;;  %v97_v25 = vmax.f32 %v88_v21, 0.0 }
  0x8b   :  { %123 = vmatpush.msra.mxu1 %v99_v16 }
  0x8e   :  { %v90_v20 = vpop.f32.mrf.mxu2 }
  0x8f   :  { %v91_v22 = vadd.f32 %v90_v20, %v43_v17 }
  0x91   :  { %v98_v24 = vmax.f32 %v91_v22, 0.0 }
  0x93   :  { %124 = vmatpush.msra.mxu1 %v98_v24 }
  0x95   :  { %125 = vmatpush.msra.mxu1 %v97_v25 }
  0x97   :  { %126 = vmatpush.msra.mxu1 %v96_v26 }
  0x98   :  { %172 = vmatmul.msk.f32.vlgmr.msra.gmra.mxu1 %vm107_vm2, %v100_v27 }
 0x115   :  { %v128_v29 = vpop.f32.mrf.mxu1 }
 0x116   :  { %v129_v30 = vadd.f32 %v128_v29, %v105_v28 }
 0x118   :  { %v173_v31 = vmul.f32 -1.442695, %v129_v30 }
 0x11a   :  { %181 = vpow2.f32 %v173_v31 }
 0x120   :  { %v182_v32 = vpop.eup %181 }
 0x121   :  { %v134_v33 = vadd.f32 1.0, %v182_v32 }
 0x123   :  { %183 = vrcp.f32 %v134_v33  ;;  %v146_v37 = vand.u32 2147483648, %v134_v33  ;;  %v144_v39 = vand.u32 2147483647, %v134_v33  ;;  %vm140_vm4 = vweird.f32 %v134_v33 }
 0x125   :  { %v147_v41 = vor.u32 1.1754944e-38, %v146_v37  ;;  %vm145_vm6 = vcmp.eq.f32.partialorder %v144_v39, 8.507059e+37 }
 0x129   :  { %v184_v34 = vpop.eup %183 }
 0x12a   :  { %v136_v35 = vmul.f32 %v184_v34, %v134_v33  ;;  %vm141_vm3 = vweird.f32 %v184_v34 }
 0x12b   :  { %vm142_vm5 = vmor %vm140_vm4, %vm141_vm3 }
 0x12c   :  { %v137_v36 = vsub.f32 1.0, %v136_v35 }
 0x12e   :  { %v138_v38 = vmul.f32 %v184_v34, %v137_v36 }
 0x130   :  { %v139_v40 = vadd.f32 %v184_v34, %v138_v38 }
 0x132   :  { %v143_v42 = vsel %vm142_vm5, %v184_v34, %v139_v40 }
 0x133   :  { %v148_v43 = vsel %vm145_vm6, %v147_v41, %v143_v42 }
 0x134   :  { %150 = vst [vmem:[#allocation2] sm:$0x3] %v148_v43 }
 0x135   :  { %161 = dma.vmem_to_hbm [thread:$0]  %s157_s3, 32, %s159_s14, [#allocation3]  }
 0x136   :  { %209 = dma.done.wait [#allocation3], 32  }
 0x137   :  { %210 = vsyncadd [#allocation3], 4294967264 }
 0x138   :  { %166 = vsyncpa [#allocation3], 1 }

</bundles_post_ra>
